<compile_context>
chip_gen: v7x
topology: tpu7x:2x2x1
jax: 0.10.0
libtpu: 0.0.40
codegen_flags: <defaults>
</compile_context>

<pallas_src>
import jax
import jax.numpy as jnp
from jax.experimental import pallas as pl
from jax.experimental.pallas import tpu as pltpu


# ----------------------------------------------------------------------------
# Fused MLP kernel:  y = SiLU(x @ W1 + b1) @ W2 + b2
# ----------------------------------------------------------------------------
def _mlp_kernel(x_ref, w1_ref, b1_ref, w2_ref, b2_ref, o_ref):
    # x_ref : (TB, D)  bf16 batch tile of text features
    # w1_ref: (D, H)   bf16 first Linear weight  (resident in VMEM)
    # b1_ref: (1, H)   f32  first Linear bias
    # w2_ref: (H, H)   bf16 second Linear weight (resident in VMEM)
    # b2_ref: (1, H)   f32  second Linear bias
    # o_ref : (TB, H)  f32  output tile (lane-dense: H multiple of 128)
    h = jnp.dot(x_ref[...], w1_ref[...], preferred_element_type=jnp.float32)
    h = h + b1_ref[...]
    # SiLU in f32 (v5e has no bf16 VPU/EUP); reciprocal on the EUP slot.
    h = h * pl.reciprocal(1.0 + jnp.exp(-h), approx=True)
    # Feed the second matmul in the MXU-native dtype; accumulate in f32.
    h = h.astype(jnp.bfloat16)
    y = jnp.dot(h, w2_ref[...], preferred_element_type=jnp.float32)
    y = y + b2_ref[...]
    o_ref[...] = y.astype(o_ref.dtype)


def language_embedder_mlp(t_emb, w1, b1, w2, b2, *, block_b=256):
    """t_emb: (B, D) float32 text features (D = language_embedding, e.g. 512)
       w1:    (D, H)   b1: (H,)   -- first  nn.Linear, (in, out) layout: x @ W + b
       w2:    (H, H)   b2: (H,)   -- second nn.Linear
       returns (B, H) float32, matching LanguageEmbedder's MLP.

       NOTE: PyTorch nn.Linear stores weights as (out, in); transpose when
       porting a state_dict."""
    B, D = t_emb.shape
    H = w1.shape[1]

    # bf16 packs 16 sublanes per vreg -> pad/round the batch tile to x16.
    SUB = 16
    b_rounded = ((B + SUB - 1) // SUB) * SUB
    # Whole batch in one tile when it fits in block_b rows; else tile by block_b.
    tb = b_rounded if b_rounded <= block_b else block_b
    Bp = ((B + tb - 1) // tb) * tb
    x = t_emb if Bp == B else jnp.pad(t_emb, ((0, Bp - B), (0, 0)))

    # bf16 matmul operands, f32 biases / output.
    x_bf = x.astype(jnp.bfloat16)
    w1_bf = w1.astype(jnp.bfloat16)
    w2_bf = w2.astype(jnp.bfloat16)
    b1_2d = b1.reshape(1, H).astype(jnp.float32)
    b2_2d = b2.reshape(1, H).astype(jnp.float32)

    n_tiles = Bp // tb
    # Megacore sharding only pays once per-core compute exceeds the duplicated
    # resident-weight DMA; for tiny grids keep it off.
    dims = ("parallel",) if n_tiles >= 4 else ("arbitrary",)

    cost = pl.CostEstimate(
        flops=2 * Bp * (D * H + H * H),
        transcendentals=Bp * H,                               # exp / recip
        bytes_accessed=(2 * (Bp * D + D * H + H * H)          # bf16 x, W1, W2
                        + 4 * (2 * H + Bp * H)),              # f32 biases + out
    )

    out = pl.pallas_call(
        _mlp_kernel,
        out_shape=jax.ShapeDtypeStruct((Bp, H), jnp.float32),
        grid_spec=pl.GridSpec(
            grid=(n_tiles,),
            in_specs=[
                pl.BlockSpec((tb, D), lambda i: (i, 0)),   # batch tile of x
                pl.BlockSpec((D, H), lambda i: (0, 0)),    # W1 resident
                pl.BlockSpec((1, H), lambda i: (0, 0)),    # b1 resident
                pl.BlockSpec((H, H), lambda i: (0, 0)),    # W2 resident
                pl.BlockSpec((1, H), lambda i: (0, 0)),    # b2 resident
            ],
            out_specs=pl.BlockSpec((tb, H), lambda i: (i, 0)),
        ),
        compiler_params=pltpu.CompilerParams(dimension_semantics=dims),
        cost_estimate=cost,
    )(x_bf, w1_bf, b1_2d, w2_bf, b2_2d)

    return out[:B] if Bp != B else out


# TODO(synk): model_clip.encode_text (frozen CLIP text encoder) has no clean
# Pallas equivalent; the kernel consumes precomputed 512-d text features.
def language_embedder_forward(text_features, w1, b1, w2, b2):
    """Full LanguageEmbedder.forward minus the frozen CLIP encoder."""
    return language_embedder_mlp(text_features, w1, b1, w2, b2)


# ----------------------------------------------------------------------------
# Pure-JAX f32 reference for correctness checking
# ----------------------------------------------------------------------------
def language_embedder_ref(t_emb, w1, b1, w2, b2):
    h = jnp.dot(t_emb, w1, preferred_element_type=jnp.float32) + b1
    h = h * jax.nn.sigmoid(h)
    return jnp.dot(h, w2, preferred_element_type=jnp.float32) + b2


if __name__ == "__main__":
    # Shapes consistent with the module:
    #   language_embedding = 512 (CLIP text feature dim), hidden_size = 256
    B, D, H = 8, 512, 256

    key = jax.random.PRNGKey(0)
    kx, k1, kb1, k2, kb2 = jax.random.split(key, 5)

    # stand-in for CLIP text features (the encoder itself is not translated)
    t_emb = jax.random.normal(kx, (B, D), dtype=jnp.float32)

    # nn.Linear-style init, stored as (in, out) for x @ W + b
    w1 = jax.random.normal(k1, (D, H), dtype=jnp.float32) * (1.0 / D ** 0.5)
    b1 = jax.random.normal(kb1, (H,), dtype=jnp.float32) * 0.01
    w2 = jax.random.normal(k2, (H, H), dtype=jnp.float32) * (1.0 / H ** 0.5)
    b2 = jax.random.normal(kb2, (H,), dtype=jnp.float32) * 0.01

    out = language_embedder_forward(t_emb, w1, b1, w2, b2)
    out = jax.block_until_ready(out)

    ref = language_embedder_ref(t_emb, w1, b1, w2, b2)
    assert out.shape == (B, H), out.shape
    # bf16 weights/activations in the kernel -> loosened tolerance vs f32 ref.
    assert jnp.allclose(out, ref, rtol=5e-2, atol=5e-2), float(
        jnp.max(jnp.abs(out - ref))
    )
    print("KERNEL_OK")
</pallas_src>

<mosaic_0001>
module attributes {stable_mosaic.version = 11 : i64} {
  func.func @_mlp_kernel(%arg0: i32, %arg1: memref<16x512xbf16, #tpu.memory_space<vmem>>, %arg2: memref<512x256xbf16, #tpu.memory_space<vmem>>, %arg3: memref<1x256xf32, #tpu.memory_space<vmem>>, %arg4: memref<256x256xbf16, #tpu.memory_space<vmem>>, %arg5: memref<1x256xf32, #tpu.memory_space<vmem>>, %arg6: memref<16x256xf32, #tpu.memory_space<vmem>>) attributes {dimension_semantics = [#tpu.dimension_semantics<arbitrary>], iteration_bounds = array<i64: 1>, scalar_prefetch = 0 : i64, scratch_operands = 0 : i64, tpu.core_type = #tpu.core_type<tc>, window_params = [{transform_indices = @transform_0, window_bounds = array<i64: 16, 512>}, {pipeline_mode = #tpu.pipeline_mode<synchronous>, transform_indices = @transform_1, window_bounds = array<i64: 512, 256>}, {pipeline_mode = #tpu.pipeline_mode<synchronous>, transform_indices = @transform_2, window_bounds = array<i64: 1, 256>}, {pipeline_mode = #tpu.pipeline_mode<synchronous>, transform_indices = @transform_3, window_bounds = array<i64: 256, 256>}, {pipeline_mode = #tpu.pipeline_mode<synchronous>, transform_indices = @transform_4, window_bounds = array<i64: 1, 256>}, {transform_indices = @transform_5, window_bounds = array<i64: 16, 256>}]} {
    %c0 = arith.constant 0 : index
    %c0_0 = arith.constant 0 : index
    %0 = vector.load %arg1[%c0, %c0_0] : memref<16x512xbf16, #tpu.memory_space<vmem>>, vector<16x512xbf16>
    %c0_1 = arith.constant 0 : index
    %c0_2 = arith.constant 0 : index
    %1 = vector.load %arg2[%c0_1, %c0_2] : memref<512x256xbf16, #tpu.memory_space<vmem>>, vector<512x256xbf16>
    %cst = arith.constant dense<0.000000e+00> : vector<16x256xf32>
    %2 = tpu.matmul %0, %1, %cst {dimension_numbers = #tpu.dot_dimension_numbers<[1], [0], [0], [1], [0, 0, 1, 1], [], []>} : vector<16x512xbf16>, vector<512x256xbf16>, vector<16x256xf32> -> vector<16x256xf32>
    %c0_3 = arith.constant 0 : index
    %c0_4 = arith.constant 0 : index
    %3 = vector.load %arg3[%c0_3, %c0_4] : memref<1x256xf32, #tpu.memory_space<vmem>>, vector<1x256xf32>
    %4 = vector.broadcast %3 : vector<1x256xf32> to vector<16x256xf32>
    %5 = arith.addf %2, %4 : vector<16x256xf32>
    %cst_5 = arith.constant 0.000000e+00 : f32
    %6 = vector.broadcast %cst_5 : f32 to vector<16x256xf32>
    %7 = arith.subf %6, %5 : vector<16x256xf32>
    %8 = math.exp %7 : vector<16x256xf32>
    %cst_6 = arith.constant 1.000000e+00 : f32
    %9 = vector.broadcast %cst_6 : f32 to vector<16x256xf32>
    %10 = arith.addf %9, %8 : vector<16x256xf32>
    %11 = tpu.reciprocal %10 {approx = true} : vector<16x256xf32> -> vector<16x256xf32>
    %12 = arith.mulf %5, %11 : vector<16x256xf32>
    %13 = arith.truncf %12 : vector<16x256xf32> to vector<16x256xbf16>
    %c0_7 = arith.constant 0 : index
    %c0_8 = arith.constant 0 : index
    %14 = vector.load %arg4[%c0_7, %c0_8] : memref<256x256xbf16, #tpu.memory_space<vmem>>, vector<256x256xbf16>
    %cst_9 = arith.constant dense<0.000000e+00> : vector<16x256xf32>
    %15 = tpu.matmul %13, %14, %cst_9 {dimension_numbers = #tpu.dot_dimension_numbers<[1], [0], [0], [1], [0, 0, 1, 1], [], []>} : vector<16x256xbf16>, vector<256x256xbf16>, vector<16x256xf32> -> vector<16x256xf32>
    %c0_10 = arith.constant 0 : index
    %c0_11 = arith.constant 0 : index
    %16 = vector.load %arg5[%c0_10, %c0_11] : memref<1x256xf32, #tpu.memory_space<vmem>>, vector<1x256xf32>
    %17 = vector.broadcast %16 : vector<1x256xf32> to vector<16x256xf32>
    %18 = arith.addf %15, %17 : vector<16x256xf32>
    %c0_12 = arith.constant 0 : index
    %c0_13 = arith.constant 0 : index
    %19 = vector.load %arg6[%c0_12, %c0_13] : memref<16x256xf32, #tpu.memory_space<vmem>>, vector<16x256xf32>
    tpu.vector_store %arg6[%c0_12, %c0_13], %18 {strides = array<i32>} : memref<16x256xf32, #tpu.memory_space<vmem>>, vector<16x256xf32>,
    return
  }
  func.func @transform_0(%arg0: i32) -> (i32, i32) {
    %c0_i32 = arith.constant 0 : i32
    %c0_i32_0 = arith.constant 0 : i32
    return %arg0, %c0_i32 : i32, i32
  }
  func.func @transform_1(%arg0: i32) -> (i32, i32) {
    %c0_i32 = arith.constant 0 : i32
    %c0_i32_0 = arith.constant 0 : i32
    %c0_i32_1 = arith.constant 0 : i32
    return %c0_i32, %c0_i32_0 : i32, i32
  }
  func.func @transform_2(%arg0: i32) -> (i32, i32) {
    %c0_i32 = arith.constant 0 : i32
    %c0_i32_0 = arith.constant 0 : i32
    %c0_i32_1 = arith.constant 0 : i32
    return %c0_i32, %c0_i32_0 : i32, i32
  }
  func.func @transform_3(%arg0: i32) -> (i32, i32) {
    %c0_i32 = arith.constant 0 : i32
    %c0_i32_0 = arith.constant 0 : i32
    %c0_i32_1 = arith.constant 0 : i32
    return %c0_i32, %c0_i32_0 : i32, i32
  }
  func.func @transform_4(%arg0: i32) -> (i32, i32) {
    %c0_i32 = arith.constant 0 : i32
    %c0_i32_0 = arith.constant 0 : i32
    %c0_i32_1 = arith.constant 0 : i32
    return %c0_i32, %c0_i32_0 : i32, i32
  }
  func.func @transform_5(%arg0: i32) -> (i32, i32) {
    %c0_i32 = arith.constant 0 : i32
    %c0_i32_0 = arith.constant 0 : i32
    return %arg0, %c0_i32 : i32, i32
  }
}

</mosaic_0001>

<bundles_post_ra>
// kernel: tpu_custom_call.1
= control target key start
LH: loop header
LB: loop body
LE: loop exit
PB: predicated region body
PF: predicated region fallthrough
CT: control target
= control target key end

     0   :  { %10 = vsyncpa [#allocation3], 0  ;;  %s1343_s0 = inlined_call_operand.hbm [shape: bf16[16,512], index: 0, kind: input, shape index: {}]   ;;  %s1344_s1 = inlined_call_operand.hbm [shape: bf16[512,256], index: 1, kind: input, shape index: {}]   ;;  %s1345_s2 = inlined_call_operand.vmem [shape: f32[1,256], index: 2, kind: input, shape index: {}]   ;;  %s1346_s3 = inlined_call_operand.hbm [shape: bf16[256,256], index: 3, kind: input, shape index: {}]   ;;  %s1347_s4 = inlined_call_operand.vmem [shape: f32[1,256], index: 4, kind: input, shape index: {}]   ;;  %s1348_s5 = inlined_call_operand.hbm [shape: f32[16,256], index: 5, kind: output, shape index: {}]  }
   0x1   :  { %11 = vsyncpa [#allocation6], 0 }
   0x2   :  { %12 = vsyncpa [#allocation4], 0  ;;  %s1239_s18 = smov [#allocation5]   ;;  %s1145_s22 = scalar_lea.hbm %s1344_s1, 8192 }
   0x3   :  { %s30_s19 = sshll.u32 %s1239_s18, 4  ;;  %p1146_p0 = scmp.ne.s32.totalorder %s1344_s1, %s1145_s22  ;;  %s31_s19 = int_to_ptr.vmem [resolvable:$true] %s30_s19 }
   0x4   :  { %p1149_p1 = scmp.lt.u32.totalorder %s1145_s22, %s1344_s1 }
   0x6   :  { %p1151_p2 = pnand %p1149_p1, %p1146_p0 }
   0x8   :  { %1154 = shalt.err (!%p1151_p2)
}
   0x9   :  { %s1155_s27 = scalar_lea.vmem %s31_s19, 8192  ;;  %p1160_p4 = scmp.lt.s32.totalorder %s31_s19, %s31_s19 }
   0xa   :  { %p1156_p3 = scmp.ne.s32.totalorder %s31_s19, %s1155_s27  ;;  %p1161_p5 = scmp.lt.s32.totalorder %s1155_s27, %s1155_s27 }
   0xc   :  { %p1162_p6 = por %p1161_p5, %p1160_p4 }
   0xe   :  { %p1163_p7 = pnand %p1162_p6, %p1156_p3 }
  0x10   :  { %1166 = shalt.err (!%p1163_p7)
}
  0x11   :  { %s1240_s28 = smov 128   ;;  %s1241_s29 = smov 8  }
  0x12   :  { %36 = dma.hbm_to_vmem [thread:$0]  %s1344_s1, 8192, %s31_s19, [#allocation6], %s1240_s28, %s1240_s28, %s1241_s29  }
  0x13   :  { %s1242_s7 = smov [#allocation2]   ;;  %s1167_s11 = scalar_lea.hbm %s1343_s0, 512 }
  0x14   :  { %s18_s8 = sshll.u32 %s1242_s7, 4  ;;  %p1168_p8 = scmp.ne.s32.totalorder %s1343_s0, %s1167_s11  ;;  %s19_s8 = int_to_ptr.vmem [resolvable:$true] %s18_s8 }
  0x15   :  { %p1171_p9 = scmp.lt.u32.totalorder %s1167_s11, %s1343_s0 }
  0x17   :  { %p1173_p10 = pnand %p1171_p9, %p1168_p8 }
  0x19   :  { %1176 = shalt.err (!%p1173_p10)
}
  0x1a   :  { %s1177_s16 = scalar_lea.vmem %s19_s8, 512  ;;  %p1182_p12 = scmp.lt.s32.totalorder %s19_s8, %s19_s8 }
  0x1b   :  { %p1178_p11 = scmp.ne.s32.totalorder %s19_s8, %s1177_s16  ;;  %p1183_p13 = scmp.lt.s32.totalorder %s1177_s16, %s1177_s16 }
  0x1d   :  { %p1184_p0 = por %p1183_p13, %p1182_p12 }
  0x1f   :  { %p1185_p1 = pnand %p1184_p0, %p1178_p11 }
  0x21   :  { %1188 = shalt.err (!%p1185_p1)
}
  0x22   :  { %s1243_s1 = smov 256   ;;  %s1244_s17 = smov 16  }
  0x23   :  { %24 = dma.hbm_to_vmem [thread:$0]  %s1343_s0, 512, %s19_s8, [#allocation3], %s1243_s1, %s1243_s1, %s1244_s17  }
  0x24   :  { %s1245_s20 = smov [#allocation7]   ;;  %s1189_s24 = scalar_lea.hbm %s1346_s3, 4096 }
  0x25   :  { %s44_s21 = sshll.u32 %s1245_s20, 4  ;;  %p1190_p2 = scmp.ne.s32.totalorder %s1346_s3, %s1189_s24  ;;  %s45_s21 = int_to_ptr.vmem [resolvable:$true] %s44_s21 }
  0x26   :  { %p1193_p3 = scmp.lt.u32.totalorder %s1189_s24, %s1346_s3 }
  0x28   :  { %p1195_p4 = pnand %p1193_p3, %p1190_p2 }
  0x2a   :  { %1198 = shalt.err (!%p1195_p4)
}
  0x2b   :  { %s1199_s6 = scalar_lea.vmem %s45_s21, 4096  ;;  %p1204_p6 = scmp.lt.s32.totalorder %s45_s21, %s45_s21 }
  0x2c   :  { %p1200_p5 = scmp.ne.s32.totalorder %s45_s21, %s1199_s6  ;;  %p1205_p7 = scmp.lt.s32.totalorder %s1199_s6, %s1199_s6 }
  0x2e   :  { %p1206_p8 = por %p1205_p7, %p1204_p6 }
  0x30   :  { %p1207_p9 = pnand %p1206_p8, %p1200_p5 }
  0x32   :  { %1210 = shalt.err (!%p1207_p9)
}
  0x33   :  { %50 = dma.hbm_to_vmem [thread:$0]  %s1346_s3, 4096, %s45_s21, [#allocation6], %s1240_s28, %s1240_s28, %s1241_s29  }
  0x34   :  { %1233 = dma.done.wait [#allocation3], 512  }
  0x35   :  { %1234 = vsyncadd [#allocation3], 4294966784 }
  0x36   :  { %1235 = dma.done.wait [#allocation6], 12288  }
  0x37   :  { %1236 = vsyncadd [#allocation6], 4294955008  ;;  %v979_v0 = vld [vmem:[#allocation5 + $0x4] ss:$8 sps:$4 sm:$0xff]   ;;  %v981_v1 = vld [vmem:[#allocation5] ss:$8 sps:$4 sm:$0xff]  }
  0x38   :  { %482 = vmatprep.subr.bf16.mxu0 %v979_v0  ;;  %v982_v2 = vld [vmem:[#allocation5 + $0x14] ss:$8 sps:$4 sm:$0xff]   ;;  %v984_v3 = vld [vmem:[#allocation5 + $0x10] ss:$8 sps:$4 sm:$0xff]   ;;  %v985_v4 = vld [vmem:[#allocation5 + $0x24] ss:$8 sps:$4 sm:$0xff]  }
  0x39   :  { %483 = vmatpush1.bf16.msra.mxu0 %v981_v1  ;;  %v987_v5 = vld [vmem:[#allocation5 + $0x20] ss:$8 sps:$4 sm:$0xff]   ;;  %v988_v6 = vld [vmem:[#allocation5 + $0x34] ss:$8 sps:$4 sm:$0xff]   ;;  %v990_v7 = vld [vmem:[#allocation5 + $0x30] ss:$8 sps:$4 sm:$0xff]  }
  0x3a   :  { %484 = vmatprep.subr.bf16.mxu0 %v982_v2  ;;  %v991_v8 = vld [vmem:[#allocation5 + $0x44] ss:$8 sps:$4 sm:$0xff]   ;;  %v993_v9 = vld [vmem:[#allocation5 + $0x40] ss:$8 sps:$4 sm:$0xff]   ;;  %v994_v10 = vld [vmem:[#allocation5 + $0x54] ss:$8 sps:$4 sm:$0xff]  }
  0x3b   :  { %v996_v11 = vld [vmem:[#allocation5 + $0x50] ss:$8 sps:$4 sm:$0xff]   ;;  %v997_v12 = vld [vmem:[#allocation5 + $0x64] ss:$8 sps:$4 sm:$0xff]   ;;  %v999_v14 = vld [vmem:[#allocation5 + $0x60] ss:$8 sps:$4 sm:$0xff]  }
  0x3c   :  { %v1029_v13 = vld [vmem:[#allocation2 + $0x4] ss:$16 sps:$4 sm:$0xff]   ;;  %v1002_v16 = vld [vmem:[#allocation5 + $0x70] ss:$8 sps:$4 sm:$0xff]   ;;  %v1005_v18 = vld [vmem:[#allocation5 + $0x80] ss:$8 sps:$4 sm:$0xff]  }
  0x3d   :  { %485 = vmatpush1.bf16.msra.mxu0 %v984_v3  ;;  %v1000_v15 = vld [vmem:[#allocation5 + $0x74] ss:$8 sps:$4 sm:$0xff]   ;;  %514 = vmatprep.mubr.bf16.mxu0 %v1029_v13  ;;  %v1003_v17 = vld [vmem:[#allocation5 + $0x84] ss:$8 sps:$4 sm:$0xff]   ;;  %v1008_v20 = vld [vmem:[#allocation5 + $0x90] ss:$8 sps:$4 sm:$0xff]  }
  0x3e   :  { %486 = vmatprep.subr.bf16.mxu0 %v985_v4  ;;  %v1006_v19 = vld [vmem:[#allocation5 + $0x94] ss:$8 sps:$4 sm:$0xff]   ;;  %v1009_v21 = vld [vmem:[#allocation5 + $0xa4] ss:$8 sps:$4 sm:$0xff]   ;;  %v1011_v22 = vld [vmem:[#allocation5 + $0xa0] ss:$8 sps:$4 sm:$0xff]  }
  0x3f   :  { %v1012_v23 = vld [vmem:[#allocation5 + $0xb4] ss:$8 sps:$4 sm:$0xff]   ;;  %v1014_v24 = vld [vmem:[#allocation5 + $0xb0] ss:$8 sps:$4 sm:$0xff]   ;;  %v1015_v25 = vld [vmem:[#allocation5 + $0xc4] ss:$8 sps:$4 sm:$0xff]  }
  0x40   :  { %v1081_v26 = vld [vmem:[#allocation7 + $0x4] ss:$8 sps:$4 sm:$0xff]   ;;  %v1083_v27 = vld [vmem:[#allocation7] ss:$8 sps:$4 sm:$0xff]   ;;  %v1084_v29 = vld [vmem:[#allocation7 + $0x14] ss:$8 sps:$4 sm:$0xff]  }
  0x41   :  { %487 = vmatpush1.bf16.msra.mxu0 %v987_v5  ;;  %v1017_v28 = vld [vmem:[#allocation5 + $0xc0] ss:$8 sps:$4 sm:$0xff]   ;;  %v1018_v30 = vld [vmem:[#allocation5 + $0xd4] ss:$8 sps:$4 sm:$0xff]   ;;  %798 = vmatprep.subr.bf16.mxu1 %v1081_v26  ;;  %v1086_v31 = vld [vmem:[#allocation7 + $0x10] ss:$8 sps:$4 sm:$0xff]  }
  0x42   :  { %488 = vmatprep.subr.bf16.mxu0 %v988_v6  ;;  %799 = vmatpush1.bf16.msra.mxu1 %v1083_v27  ;;  %v1087_v32 = vld [vmem:[#allocation7 + $0x24] ss:$8 sps:$4 sm:$0xff]   ;;  %v1020_v33 = vld [vmem:[#allocation5 + $0xd0] ss:$8 sps:$4 sm:$0xff]   ;;  %v1023_v35 = vld [vmem:[#allocation5 + $0xe0] ss:$8 sps:$4 sm:$0xff]  }
  0x43   :  { %800 = vmatprep.subr.bf16.mxu1 %v1084_v29  ;;  %v1021_v34 = vld [vmem:[#allocation5 + $0xe4] ss:$8 sps:$4 sm:$0xff]   ;;  %v1089_v36 = vld [vmem:[#allocation7 + $0x20] ss:$8 sps:$4 sm:$0xff]   ;;  %v1024_v37 = vld [vmem:[#allocation5 + $0xf4] ss:$8 sps:$4 sm:$0xff]  }
  0x44   :  { %v1090_v38 = vld [vmem:[#allocation7 + $0x34] ss:$8 sps:$4 sm:$0xff]   ;;  %v1092_v39 = vld [vmem:[#allocation7 + $0x30] ss:$8 sps:$4 sm:$0xff]   ;;  %v1093_v40 = vld [vmem:[#allocation7 + $0x44] ss:$8 sps:$4 sm:$0xff]  }
  0x45   :  { %489 = vmatpush1.bf16.msra.mxu0 %v990_v7  ;;  %v1026_v41 = vld [vmem:[#allocation5 + $0xf0] ss:$8 sps:$4 sm:$0xff]   ;;  %v1032_v42 = vld [vmem:[#allocation5 + $0x104] ss:$8 sps:$4 sm:$0xff]   ;;  %v1095_v43 = vld [vmem:[#allocation7 + $0x40] ss:$8 sps:$4 sm:$0xff]  }
  0x46   :  { %490 = vmatprep.subr.bf16.mxu0 %v991_v8  ;;  %801 = vmatpush1.bf16.msra.mxu1 %v1086_v31  ;;  %v1027_v44 = vld [vmem:[#allocation2] ss:$16 sps:$4 sm:$0xff]   ;;  %v1096_v45 = vld [vmem:[#allocation7 + $0x54] ss:$8 sps:$4 sm:$0xff]   ;;  %v1099_v50 = vld [vmem:[#allocation7 + $0x64] ss:$8 sps:$4 sm:$0xff]  }
  0x47   :  { %802 = vmatprep.subr.bf16.mxu1 %v1087_v32  ;;  %v1030_v46 = vld [vmem:[#allocation5 + $0x100] ss:$8 sps:$4 sm:$0xff]   ;;  %v1080_v47 = vld [vmem:[#allocation2 + $0xc] ss:$16 sps:$4 sm:$0xff]   ;;  %v1098_v49 = vld [vmem:[#allocation7 + $0x50] ss:$8 sps:$4 sm:$0xff]  }
  0x48   :  { %v1035_v48 = vld [vmem:[#allocation5 + $0x114] ss:$8 sps:$4 sm:$0xff]   ;;  %v1033_v51 = vld [vmem:[#allocation5 + $0x110] ss:$8 sps:$4 sm:$0xff]   ;;  %v1038_v52 = vld [vmem:[#allocation5 + $0x124] ss:$8 sps:$4 sm:$0xff]  }
  0x49   :  { %491 = vmatpush1.bf16.msra.mxu0 %v993_v9  ;;  %v1036_v53 = vld [vmem:[#allocation5 + $0x120] ss:$8 sps:$4 sm:$0xff]   ;;  %v1041_v54 = vld [vmem:[#allocation5 + $0x134] ss:$8 sps:$4 sm:$0xff]   ;;  %v1039_v55 = vld [vmem:[#allocation5 + $0x130] ss:$8 sps:$4 sm:$0xff]  }
  0x4a   :  { %492 = vmatprep.subr.bf16.mxu0 %v994_v10  ;;  %803 = vmatpush1.bf16.msra.mxu1 %v1089_v36  ;;  %v1044_v56 = vld [vmem:[#allocation5 + $0x144] ss:$8 sps:$4 sm:$0xff]   ;;  %v1042_v57 = vld [vmem:[#allocation5 + $0x140] ss:$8 sps:$4 sm:$0xff]   ;;  %v1047_v58 = vld [vmem:[#allocation5 + $0x154] ss:$8 sps:$4 sm:$0xff]   ;;  %v132_v36 = vlaneseq }
  0x4b   :  { %804 = vmatprep.subr.bf16.mxu1 %v1090_v38  ;;  %v1045_v59 = vld [vmem:[#allocation5 + $0x150] ss:$8 sps:$4 sm:$0xff]   ;;  %v1050_v60 = vld [vmem:[#allocation5 + $0x164] ss:$8 sps:$4 sm:$0xff]   ;;  %v1048_v61 = vld [vmem:[#allocation5 + $0x160] ss:$8 sps:$4 sm:$0xff]  }
  0x4c   :  { %v1053_v62 = vld [vmem:[#allocation5 + $0x174] ss:$8 sps:$4 sm:$0xff]   ;;  %v1051_v63 = vld [vmem:[#allocation5 + $0x170] ss:$8 sps:$4 sm:$0xff]   ;;  %v1056_v0 = vld [vmem:[#allocation5 + $0x184] ss:$8 sps:$4 sm:$0xff]  }
  0x4d   :  { %493 = vmatpush1.bf16.msra.mxu0 %v996_v11  ;;  %v1054_v1 = vld [vmem:[#allocation5 + $0x180] ss:$8 sps:$4 sm:$0xff]   ;;  %v1059_v2 = vld [vmem:[#allocation5 + $0x194] ss:$8 sps:$4 sm:$0xff]   ;;  %v1057_v3 = vld [vmem:[#allocation5 + $0x190] ss:$8 sps:$4 sm:$0xff]  }
  0x4e   :  { %494 = vmatprep.subr.bf16.mxu0 %v997_v12  ;;  %805 = vmatpush1.bf16.msra.mxu1 %v1092_v39  ;;  %v1062_v4 = vld [vmem:[#allocation5 + $0x1a4] ss:$8 sps:$4 sm:$0xff]   ;;  %v1060_v5 = vld [vmem:[#allocation5 + $0x1a0] ss:$8 sps:$4 sm:$0xff]   ;;  %v1065_v6 = vld [vmem:[#allocation5 + $0x1b4] ss:$8 sps:$4 sm:$0xff]  }
  0x4f   :  { %806 = vmatprep.subr.bf16.mxu1 %v1093_v40  ;;  %v1063_v7 = vld [vmem:[#allocation5 + $0x1b0] ss:$8 sps:$4 sm:$0xff]   ;;  %v1068_v8 = vld [vmem:[#allocation5 + $0x1c4] ss:$8 sps:$4 sm:$0xff]   ;;  %v1066_v9 = vld [vmem:[#allocation5 + $0x1c0] ss:$8 sps:$4 sm:$0xff]  }
  0x50   :  { %v1071_v10 = vld [vmem:[#allocation5 + $0x1d4] ss:$8 sps:$4 sm:$0xff]   ;;  %v1069_v11 = vld [vmem:[#allocation5 + $0x1d0] ss:$8 sps:$4 sm:$0xff]   ;;  %v1074_v12 = vld [vmem:[#allocation5 + $0x1e4] ss:$8 sps:$4 sm:$0xff]  }
  0x51   :  { %495 = vmatpush1.bf16.msra.mxu0 %v999_v14  ;;  %v1072_v13 = vld [vmem:[#allocation5 + $0x1e0] ss:$8 sps:$4 sm:$0xff]   ;;  %v1077_v14 = vld [vmem:[#allocation5 + $0x1f4] ss:$8 sps:$4 sm:$0xff]   ;;  %v1116_v27 = vld [vmem:[#allocation7 + $0xb0] ss:$8 sps:$4 sm:$0xff]  }
  0x52   :  { %496 = vmatprep.subr.bf16.mxu0 %v1000_v15  ;;  %807 = vmatpush1.bf16.msra.mxu1 %v1095_v43  ;;  %v1075_v15 = vld [vmem:[#allocation5 + $0x1f0] ss:$8 sps:$4 sm:$0xff]   ;;  %v1114_v26 = vld [vmem:[#allocation7 + $0xb4] ss:$8 sps:$4 sm:$0xff]   ;;  %v1119_v29 = vld [vmem:[#allocation7 + $0xc0] ss:$8 sps:$4 sm:$0xff]  }
  0x53   :  { %808 = vmatprep.subr.bf16.mxu1 %v1096_v45  ;;  %v1122_v31 = vld [vmem:[#allocation7 + $0xd0] ss:$8 sps:$4 sm:$0xff]   ;;  %v1123_v32 = vld [vmem:[#allocation7 + $0xe4] ss:$8 sps:$4 sm:$0xff]   ;;  %v130_v39 = vld [vmem:[%s1345_s2] sm:$0x3] }
  0x54   :  { %s1246_s8 = smov [#allocation8]  }
  0x55   :  { %497 = vmatpush1.bf16.msra.mxu0 %v1002_v16  ;;  %v1078_v16 = vld [vmem:[#allocation2 + $0x8] ss:$16 sps:$4 sm:$0xff]   ;;  %s850_s9 = sshll.u32 %s1246_s8, 4  ;;  %s851_s9 = int_to_ptr.vmem [resolvable:$true] %s850_s9 }
  0x56   :  { %498 = vmatprep.subr.bf16.mxu0 %v1003_v17  ;;  %809 = vmatpush1.bf16.msra.mxu1 %v1098_v49  ;;  %v1101_v17 = vld [vmem:[#allocation7 + $0x60] ss:$8 sps:$4 sm:$0xff]   ;;  %s1211_s10 = scalar_lea.vmem %s851_s9, 512  ;;  %p1216_p11 = scmp.lt.s32.totalorder %s851_s9, %s851_s9 }
  0x57   :  { %810 = vmatprep.subr.bf16.mxu1 %v1099_v50  ;;  %p1212_p10 = scmp.ne.s32.totalorder %s851_s9, %s1211_s10  ;;  %p1217_p12 = scmp.lt.s32.totalorder %s1211_s10, %s1211_s10 }
  0x59   :  { %499 = vmatpush1.bf16.msra.mxu0 %v1005_v18  ;;  %v1102_v18 = vld [vmem:[#allocation7 + $0x74] ss:$8 sps:$4 sm:$0xff]   ;;  %p1218_p13 = por %p1217_p12, %p1216_p11 }
  0x5a   :  { %500 = vmatprep.subr.bf16.mxu0 %v1006_v19  ;;  %811 = vmatpush1.bf16.msra.mxu1 %v1101_v17  ;;  %v1104_v19 = vld [vmem:[#allocation7 + $0x70] ss:$8 sps:$4 sm:$0xff]  }
  0x5b   :  { %812 = vmatprep.subr.bf16.mxu1 %v1102_v18  ;;  %p1219_p0 = pnand %p1218_p13, %p1212_p10 }
  0x5d   :  { %501 = vmatpush1.bf16.msra.mxu0 %v1008_v20  ;;  %v1105_v20 = vld [vmem:[#allocation7 + $0x84] ss:$8 sps:$4 sm:$0xff]  }
  0x5e   :  { %502 = vmatprep.subr.bf16.mxu0 %v1009_v21  ;;  %813 = vmatpush1.bf16.msra.mxu1 %v1104_v19  ;;  %v1107_v21 = vld [vmem:[#allocation7 + $0x80] ss:$8 sps:$4 sm:$0xff]  }
  0x5f   :  { %814 = vmatprep.subr.bf16.mxu1 %v1105_v20 }
  0x61   :  { %503 = vmatpush1.bf16.msra.mxu0 %v1011_v22  ;;  %v1108_v22 = vld [vmem:[#allocation7 + $0x94] ss:$8 sps:$4 sm:$0xff]  }
  0x62   :  { %504 = vmatprep.subr.bf16.mxu0 %v1012_v23  ;;  %815 = vmatpush1.bf16.msra.mxu1 %v1107_v21  ;;  %v1110_v23 = vld [vmem:[#allocation7 + $0x90] ss:$8 sps:$4 sm:$0xff]  }
  0x63   :  { %816 = vmatprep.subr.bf16.mxu1 %v1108_v22 }
  0x65   :  { %505 = vmatpush1.bf16.msra.mxu0 %v1014_v24  ;;  %v1111_v24 = vld [vmem:[#allocation7 + $0xa4] ss:$8 sps:$4 sm:$0xff]  }
  0x66   :  { %506 = vmatprep.subr.bf16.mxu0 %v1015_v25  ;;  %817 = vmatpush1.bf16.msra.mxu1 %v1110_v23  ;;  %v1113_v25 = vld [vmem:[#allocation7 + $0xa0] ss:$8 sps:$4 sm:$0xff]  }
  0x67   :  { %818 = vmatprep.subr.bf16.mxu1 %v1111_v24 }
  0x69   :  { %507 = vmatpush1.bf16.msra.mxu0 %v1017_v28  ;;  %v1117_v28 = vld [vmem:[#allocation7 + $0xc4] ss:$8 sps:$4 sm:$0xff]  }
  0x6a   :  { %508 = vmatprep.subr.bf16.mxu0 %v1018_v30  ;;  %819 = vmatpush1.bf16.msra.mxu1 %v1113_v25  ;;  %v1120_v30 = vld [vmem:[#allocation7 + $0xd4] ss:$8 sps:$4 sm:$0xff]  }
  0x6b   :  { %820 = vmatprep.subr.bf16.mxu1 %v1114_v26 }
  0x6d   :  { %509 = vmatpush1.bf16.msra.mxu0 %v1020_v33  ;;  %v1125_v33 = vld [vmem:[#allocation7 + $0xe0] ss:$8 sps:$4 sm:$0xff]  }
  0x6e   :  { %510 = vmatprep.subr.bf16.mxu0 %v1021_v34  ;;  %821 = vmatpush1.bf16.msra.mxu1 %v1116_v27  ;;  %v1126_v34 = vld [vmem:[#allocation7 + $0xf4] ss:$8 sps:$4 sm:$0xff]  }
  0x6f   :  { %822 = vmatprep.subr.bf16.mxu1 %v1117_v28 }
  0x71   :  { %511 = vmatpush1.bf16.msra.mxu0 %v1023_v35  ;;  %v1128_v35 = vld [vmem:[#allocation7 + $0xf0] ss:$8 sps:$4 sm:$0xff]  }
  0x72   :  { %512 = vmatprep.subr.bf16.mxu0 %v1024_v37  ;;  %823 = vmatpush1.bf16.msra.mxu1 %v1119_v29  ;;  %v133_v37 = vshrl.u32 %v132_v36, 7 }
  0x73   :  { %824 = vmatprep.subr.bf16.mxu1 %v1120_v30 }
  0x74   :  { %v134_v38 = vsub.s32 0, %v133_v37  ;;  %v138_v40 = vsub.s32 1, %v133_v37 }
  0x75   :  { %513 = vmatpush1.bf16.msra.mxu0 %v1026_v41 }
  0x76   :  { %525 = vmatprep.subr.bf16.mxu0 %v1032_v42  ;;  %825 = vmatpush1.bf16.msra.mxu1 %v1122_v31  ;;  %v135_v41 = vrot.slane %v130_v39, %v134_v38  ;;  %v139_v42 = vrot.slane %v130_v39, %v138_v40 }
  0x77   :  { %826 = vmatprep.subr.bf16.mxu1 %v1123_v32 }
  0x78   :  { %515 = vmatmul.mubr.bf16.vlgmr.msra.gmra.mrb[0].mxu0 %v1027_v44 }
  0x79   :  { %526 = vmatpush1.bf16.msra.mxu0 %v1030_v46  ;;  %557 = vmatprep.mubr.bf16.mxu0 %v1080_v47 }
  0x7a   :  { %527 = vmatprep.subr.bf16.mxu0 %v1035_v48  ;;  %827 = vmatpush1.bf16.msra.mxu1 %v1125_v33 }
  0x7b   :  { %828 = vmatprep.subr.bf16.mxu1 %v1126_v34 }
  0x7d   :  { %528 = vmatpush1.bf16.msra.mxu0 %v1033_v51 }
  0x7e   :  { %529 = vmatprep.subr.bf16.mxu0 %v1038_v52  ;;  %829 = vmatpush1.bf16.msra.mxu1 %v1128_v35 }
  0x81   :  { %530 = vmatpush1.bf16.msra.mxu0 %v1036_v53 }
  0x82   :  { %531 = vmatprep.subr.bf16.mxu0 %v1041_v54 }
  0x85   :  { %532 = vmatpush1.bf16.msra.mxu0 %v1039_v55 }
  0x86   :  { %533 = vmatprep.subr.bf16.mxu0 %v1044_v56 }
  0x89   :  { %534 = vmatpush1.bf16.msra.mxu0 %v1042_v57 }
  0x8a   :  { %535 = vmatprep.subr.bf16.mxu0 %v1047_v58 }
  0x8d   :  { %536 = vmatpush1.bf16.msra.mxu0 %v1045_v59 }
  0x8e   :  { %537 = vmatprep.subr.bf16.mxu0 %v1050_v60 }
  0x91   :  { %538 = vmatpush1.bf16.msra.mxu0 %v1048_v61 }
  0x92   :  { %539 = vmatprep.subr.bf16.mxu0 %v1053_v62 }
  0x95   :  { %540 = vmatpush1.bf16.msra.mxu0 %v1051_v63 }
  0x96   :  { %541 = vmatprep.subr.bf16.mxu0 %v1056_v0 }
  0x99   :  { %542 = vmatpush1.bf16.msra.mxu0 %v1054_v1 }
  0x9a   :  { %543 = vmatprep.subr.bf16.mxu0 %v1059_v2 }
  0x9d   :  { %544 = vmatpush1.bf16.msra.mxu0 %v1057_v3 }
  0x9e   :  { %545 = vmatprep.subr.bf16.mxu0 %v1062_v4 }
  0xa1   :  { %546 = vmatpush1.bf16.msra.mxu0 %v1060_v5 }
  0xa2   :  { %547 = vmatprep.subr.bf16.mxu0 %v1065_v6 }
  0xa5   :  { %548 = vmatpush1.bf16.msra.mxu0 %v1063_v7 }
  0xa6   :  { %549 = vmatprep.subr.bf16.mxu0 %v1068_v8 }
  0xa9   :  { %550 = vmatpush1.bf16.msra.mxu0 %v1066_v9 }
  0xaa   :  { %551 = vmatprep.subr.bf16.mxu0 %v1071_v10 }
  0xad   :  { %552 = vmatpush1.bf16.msra.mxu0 %v1069_v11 }
  0xae   :  { %553 = vmatprep.subr.bf16.mxu0 %v1074_v12 }
  0xb1   :  { %554 = vmatpush1.bf16.msra.mxu0 %v1072_v13  ;;  %v626_v13 = vld [vmem:[%s1347_s4] sm:$0x3] }
  0xb2   :  { %555 = vmatprep.subr.bf16.mxu0 %v1077_v14  ;;  %v631_v14 = vrot.slane %v626_v13, %v134_v38 }
  0xb5   :  { %556 = vmatpush1.bf16.msra.mxu0 %v1075_v15  ;;  %v635_v15 = vrot.slane %v626_v13, %v138_v40 }
  0xb8   :  { %558 = vmatmul.mubr.bf16.vlgmr.msra.gmra.mrb[0].mxu0 %v1078_v16 }
 0x18b   :  { %v559_v43 = vpop.f32.mrb[0].mxu0 }
 0x18c   :  { %v963_v44 = vadd.f32 %v559_v43, %v135_v41  ;;  %v561_v45 = vpop.f32.mrb[1].mxu0 }
 0x18d   :  { %v964_v46 = vadd.f32 %v561_v45, %v139_v42  ;;  %v563_v47 = vpop.f32.mrb[2].mxu0 }
 0x18e   :  { %v568_v48 = vsub.f32 0.0, %v963_v44  ;;  %v965_v49 = vadd.f32 %v563_v47, %v135_v41  ;;  %v565_v50 = vpop.f32.mrb[3].mxu0 }
 0x18f   :  { %v569_v51 = vsub.f32 0.0, %v964_v46  ;;  %v966_v52 = vadd.f32 %v565_v50, %v139_v42 }
 0x190   :  { %v572_v53 = vmul.f32 1.442695, %v568_v48  ;;  %v570_v54 = vsub.f32 0.0, %v965_v49 }
 0x191   :  { %v574_v55 = vmul.f32 1.442695, %v569_v51  ;;  %v571_v56 = vsub.f32 0.0, %v966_v52 }
 0x192   :  { %1129 = vpow2.f32 %v572_v53  ;;  %v576_v57 = vmul.f32 1.442695, %v570_v54 }
 0x193   :  { %1131 = vpow2.f32 %v574_v55  ;;  %v578_v58 = vmul.f32 1.442695, %v571_v56 }
 0x194   :  { %1133 = vpow2.f32 %v576_v57 }
 0x195   :  { %1135 = vpow2.f32 %v578_v58 }
 0x19c   :  { %v1130_v59 = vpop.eup %1129 }
 0x19d   :  { %v1132_v60 = vpop.eup %1131  ;;  %v580_v61 = vadd.f32 1.0, %v1130_v59 }
 0x19e   :  { %v1134_v62 = vpop.eup %1133  ;;  %v581_v63 = vadd.f32 1.0, %v1132_v60 }
 0x19f   :  { %v1136_v0 = vpop.eup %1135  ;;  %1137 = vrcp.f32 %v580_v61  ;;  %v582_v1 = vadd.f32 1.0, %v1134_v62 }
 0x1a0   :  { %1139 = vrcp.f32 %v581_v63  ;;  %v583_v2 = vadd.f32 1.0, %v1136_v0 }
 0x1a1   :  { %1141 = vrcp.f32 %v582_v1 }
 0x1a2   :  { %1143 = vrcp.f32 %v583_v2 }
 0x1a9   :  { %v1138_v3 = vpop.eup %1137 }
 0x1aa   :  { %v1140_v4 = vpop.eup %1139  ;;  %v588_v7 = vmul.f32 %v1138_v3, %v963_v44 }
 0x1ab   :  { %v1142_v5 = vpop.eup %1141  ;;  %v589_v9 = vmul.f32 %v1140_v4, %v964_v46 }
 0x1ac   :  { %v1144_v6 = vpop.eup %1143  ;;  %v590_v8 = vmul.f32 %v1142_v5, %v965_v49 }
 0x1ad   :  { %v591_v10 = vmul.f32 %v1144_v6, %v966_v52 }
 0x1ae   :  { %v592_v11 = vpack.c.bf16 %v590_v8, %v588_v7 }
 0x1af   :  { %v593_v12 = vpack.c.bf16 %v591_v10, %v589_v9 }
 0x1b1   :  { %830 = vmatprep.mubr.bf16.mxu1 %v593_v12 }
 0x1b2   :  { %831 = vmatmul.mubr.bf16.vlgmr.msra.gmra.mrb[0].mxu1 %v592_v11 }
 0x285   :  { %v832_v16 = vpop.f32.mrb[0].mxu1 }
 0x286   :  { %v833_v17 = vadd.f32 %v832_v16, %v631_v14  ;;  %v834_v18 = vpop.f32.mrb[1].mxu1 }
 0x287   :  { %v835_v19 = vadd.f32 %v834_v18, %v635_v15  ;;  %v836_v20 = vpop.f32.mrb[2].mxu1 }
 0x288   :  { %841 = vst [vmem:[#allocation8] sm:$0xff] %v833_v17  ;;  %v837_v21 = vadd.f32 %v836_v20, %v631_v14  ;;  %v838_v22 = vpop.f32.mrb[3].mxu1 }
 0x289   :  { %842 = vst [vmem:[#allocation8 + $0x8] sm:$0xff] %v835_v19  ;;  %v839_v23 = vadd.f32 %v838_v22, %v635_v15 }
 0x28a   :  { %843 = vst [vmem:[#allocation8 + $0x10] sm:$0xff] %v837_v21 }
 0x28b   :  { %844 = vst [vmem:[#allocation8 + $0x18] sm:$0xff] %v839_v23 }
 0x28c   :  { %1222 = shalt.err (!%p1219_p0)
}
 0x28d   :  { %s1223_s12 = scalar_lea.hbm %s1348_s5, 512 }
 0x28e   :  { %p1224_p1 = scmp.ne.s32.totalorder %s1348_s5, %s1223_s12  ;;  %p1227_p2 = scmp.lt.u32.totalorder %s1223_s12, %s1348_s5 }
 0x290   :  { %p1229_p3 = pnand %p1227_p2, %p1224_p1 }
 0x292   :  { %1232 = shalt.err (!%p1229_p3)
}
 0x293   :  { %856 = dma.vmem_to_hbm [thread:$0]  %s851_s9, 512, %s1348_s5, [#allocation4], %s1243_s1, %s1243_s1, %s1244_s17  }
 0x294   :  { %1237 = dma.done.wait [#allocation4], 512  }
 0x295   :  { %1238 = vsyncadd [#allocation4], 4294966784 }
 0x296   :  { %860 = vsyncpa [#allocation3], 1 }
 0x297   :  { %861 = vsyncpa [#allocation6], 1 }
 0x298   :  { %862 = vsyncpa [#allocation4], 1 }

</bundles_post_ra>
